<compile_context>
chip_gen: v6e
topology: v6e:2x2x1
jax: 0.10.0
libtpu: 0.0.40
codegen_flags: <defaults>
</compile_context>

<pallas_src>
import functools
import math

import jax
import jax.numpy as jnp
from jax.experimental import pallas as pl
from jax.experimental.pallas import tpu as pltpu


# Minimum second-to-last block dim per element size (packed-sublane tiling).
_MIN_SUBLANE = {1: 32, 2: 16, 4: 8, 8: 8}

_LANE = 128
_TARGET_BLOCK_BYTES = 6 * 1024 * 1024   # ~6 MiB blocks: 4x block (in+out,
                                        # double-buffered) = 24 MiB footprint.
_VMEM_LIMIT_BYTES = 32 * 1024 * 1024    # <= v6e/v7x scoped defaults, raises v5e's 16 MiB.
_MIN_SPLIT_BYTES = 1 * 1024 * 1024      # above this, force >= 2 grid steps so the
                                        # 'parallel' axis can feed both v7x TCs.
_SMALL_RAGGED_BYTES = 256 * 1024        # ragged totals below this use one
                                        # full-array block (sublane padding stays
                                        # far inside the VMEM budget).


def _elementwise_kernel(fn, x_ref, o_ref):
    # Elementwise hot path: trace the user fn directly on the whole VMEM tile.
    # NOTE: output dtype is pinned to the input dtype (shape/dtype-preserving
    # elementwise fns only on this path).
    o_ref[...] = fn(x_ref[...]).astype(o_ref.dtype)


def _choose_tile_rows(rows, lanes, itemsize, min_sub):
    """Balanced, min_sub-aligned row tile.

    * largest tile with tile*lanes*itemsize <= _TARGET_BLOCK_BYTES,
    * >= 2 grid steps when there's >= 1 MiB of data, so v7x's second
      TensorCore gets work (one extra ~0.35 us step elsewhere),
    * blocks balanced so the trailing block is not a tiny remainder.
    """
    row_bytes = lanes * itemsize
    tr_max = max(min_sub, (_TARGET_BLOCK_BYTES // row_bytes) // min_sub * min_sub)
    num_blocks = pl.cdiv(rows, tr_max)
    if (num_blocks < 2 and rows >= 2 * min_sub
            and rows * row_bytes >= _MIN_SPLIT_BYTES):
        num_blocks = 2
    if num_blocks <= 1:
        return rows                       # single full-extent block
    tile_rows = pl.cdiv(pl.cdiv(rows, num_blocks), min_sub) * min_sub
    return min(tile_rows, rows)


def _run_2d(fn, x2d, tile_rows, donate):
    rows, lanes = x2d.shape
    grid = (pl.cdiv(rows, tile_rows),)
    # TODO(synk): confirm on v7x (xprof/bundle dump) that the 'parallel' axis is
    # actually sharded across both TensorCores; switch to pltpu.CORE_PARALLEL or
    # an explicit core split if it is not.
    # TODO(synk): optionally sweep pipeline_mode=pl.Buffered(3) on these specs.
    return pl.pallas_call(
        functools.partial(_elementwise_kernel, fn),
        out_shape=jax.ShapeDtypeStruct((rows, lanes), x2d.dtype),
        grid=grid,
        in_specs=[pl.BlockSpec((tile_rows, lanes), lambda i: (i, 0))],
        out_specs=pl.BlockSpec((tile_rows, lanes), lambda i: (i, 0)),
        compiler_params=pltpu.CompilerParams(
            dimension_semantics=("parallel",),
            vmem_limit_bytes=_VMEM_LIMIT_BYTES,
        ),
        input_output_aliases=({0: 0} if donate else {}),
    )(x2d)


def _pick_lanes(total):
    # Widest lane-dense last dim that exactly divides the element count.
    for c in (8192, 4096, 2048, 1024, 512, 256):
        if total % c == 0:
            return c
    return _LANE


def custom_forward(fn, x=None, *, no_argument=False, donate=False):
    """Pallas equivalent of Custom(fn, no_argument).forward(x).

    fn must be an elementwise, shape/dtype-preserving JAX-traceable function
    on the kernel path (the common hanz usage).  no_argument=True bypasses x
    entirely (pure glue, matches `return self.fn()`).  donate=True aliases the
    (flattened) input buffer to the output -- only use when the caller never
    reads x after the call (saves a full-size HBM allocation, matters on v5e).
    """
    if no_argument:
        return fn()

    x = jnp.asarray(x)
    orig_shape = x.shape
    dtype = x.dtype
    total = math.prod(orig_shape) if orig_shape else 1
    if total == 0:
        return fn(x)  # nothing to stream

    itemsize = jnp.dtype(dtype).itemsize
    min_sub = _MIN_SUBLANE.get(itemsize, 8)

    if total % _LANE == 0:
        # Common path: reshape directly into a wide lane-dense slab.
        # No padding copies, no output slicing.
        lanes = _pick_lanes(total)
        rows = total // lanes
        tile_rows = _choose_tile_rows(rows, lanes, itemsize, min_sub)
        out2d = _run_2d(fn, x.reshape(rows, lanes), tile_rows, donate)
        return out2d.reshape(orig_shape)

    if total * itemsize <= _SMALL_RAGGED_BYTES:
        # Small ragged total: one full-array block (full-extent dims are exempt
        # from the (8,128) rule).  Prefer a min_sub-tall factorization so the
        # sublane padding / vreg waste stays bounded.
        if total % min_sub == 0 and total // min_sub >= _LANE:
            rows, lanes = min_sub, total // min_sub
        else:
            rows, lanes = 1, total
        out2d = _run_2d(fn, x.reshape(rows, lanes), tile_rows=rows, donate=donate)
        return out2d.reshape(orig_shape)

    # Large ragged total: stream the lane-aligned bulk through the kernel and
    # compute the short (< lanes elems) tail with plain jnp -- no full-size
    # zero-pad copy of the input.
    # NOTE: fn is traced outside the kernel for the tail on this path, so it
    # must not use kernel-only primitives (e.g. pl.reciprocal) here.
    # TODO(synk): fold the tail into a masked last block (pltpu.store w/ mask)
    # to also drop the output concatenate if this path ever becomes hot.
    x_flat = x.reshape(-1)
    lanes = _LANE
    for c in (8192, 4096, 2048, 1024, 512, 256):
        if total // c >= 64:          # keep a healthy number of bulk rows
            lanes = c
            break
    bulk = (total // lanes) * lanes
    rows = bulk // lanes
    tile_rows = _choose_tile_rows(rows, lanes, itemsize, min_sub)
    bulk2d = x_flat[:bulk].reshape(rows, lanes)   # throwaway temp -> safe to donate
    bulk_out = _run_2d(fn, bulk2d, tile_rows, donate=True)
    tail_out = fn(x_flat[bulk:]).astype(dtype)
    out_flat = jnp.concatenate([bulk_out.reshape(-1), tail_out])
    return out_flat.reshape(orig_shape)


if __name__ == "__main__":
    # Reference elementwise activation: fn(x) = x * sigmoid(x) + 0.5 * tanh(x)
    def example_fn_ref(x):
        return x * jax.nn.sigmoid(x) + 0.5 * jnp.tanh(x)

    # EUP-friendly form used inside the kernel: ONE shared tanh via half-angle
    # identities (sigmoid(x) = (1 + tanh(x/2))/2, tanh(x) = 2t/(1 + t^2)) and
    # an approximate EUP reciprocal instead of an exact divide.
    def example_fn_kernel(x):
        t = jnp.tanh(0.5 * x)
        sig = 0.5 * (1.0 + t)
        tanh_x = (2.0 * t) * pl.reciprocal(1.0 + t * t, approx=True)
        return x * sig + 0.5 * tanh_x

    key = jax.random.PRNGKey(0)
    x = jax.random.normal(key, (2, 4, 16, 16), dtype=jnp.float32)

    ref = example_fn_ref(x)  # computed before the kernel (donation-safe)

    out = custom_forward(example_fn_kernel, x)
    out = jax.block_until_ready(out)

    assert out.shape == x.shape and out.dtype == x.dtype
    assert jnp.allclose(out, ref, atol=2e-3, rtol=2e-3)

    # Multi-block common path (forces >= 2 grid steps / balanced blocks).
    x_big = jax.random.normal(jax.random.PRNGKey(3), (512, 1024), dtype=jnp.float32)
    ref_big = example_fn_ref(x_big)
    out_big = jax.block_until_ready(custom_forward(example_fn_kernel, x_big))
    assert jnp.allclose(out_big, ref_big, atol=2e-3, rtol=2e-3)

    # Ragged-small path (total not a multiple of 128): single full-array block.
    x_odd = jax.random.normal(jax.random.PRNGKey(1), (3, 5, 7), dtype=jnp.float32)
    out_odd = jax.block_until_ready(custom_forward(lambda v: jnp.exp(v) * 0.5, x_odd))
    assert jnp.allclose(out_odd, jnp.exp(x_odd) * 0.5, atol=1e-5, rtol=1e-5)

    # Ragged-large path: lane-aligned bulk through the kernel + plain-jnp tail.
    x_rag = jax.random.normal(jax.random.PRNGKey(4), (515, 301), dtype=jnp.float32)
    rag_fn = lambda v: jnp.sqrt(jnp.abs(v)) + 0.25 * v
    out_rag = jax.block_until_ready(custom_forward(rag_fn, x_rag))
    assert out_rag.shape == x_rag.shape
    assert jnp.allclose(out_rag, rag_fn(x_rag), atol=1e-5, rtol=1e-5)

    # bf16 path exercises the dtype-aware sublane handling.
    x_bf = jax.random.normal(jax.random.PRNGKey(2), (4, 16, 64), dtype=jnp.bfloat16)
    out_bf = jax.block_until_ready(custom_forward(lambda v: v * 2.0, x_bf))
    assert out_bf.dtype == jnp.bfloat16
    assert jnp.allclose(
        out_bf.astype(jnp.float32), (x_bf * 2.0).astype(jnp.float32),
        atol=1e-2, rtol=1e-2,
    )

    # no_argument=True path (glue, returns fn() untouched).
    const = custom_forward(lambda: jnp.float32(3.0), None, no_argument=True)
    assert float(const) == 3.0

    print("KERNEL_OK")
</pallas_src>

<mosaic_0001>
module attributes {stable_mosaic.version = 11 : i64} {
  func.func @_elementwise_kernel(%arg0: i32, %arg1: memref<1x2048xf32, #tpu.memory_space<vmem>>, %arg2: memref<1x2048xf32, #tpu.memory_space<vmem>>) attributes {dimension_semantics = [#tpu.dimension_semantics<parallel>], iteration_bounds = array<i64: 1>, scalar_prefetch = 0 : i64, scratch_operands = 0 : i64, tpu.core_type = #tpu.core_type<tc>, window_params = [{transform_indices = @transform_0, window_bounds = array<i64: 1, 2048>}, {transform_indices = @transform_1, window_bounds = array<i64: 1, 2048>}]} {
    %c0 = arith.constant 0 : index
    %c0_0 = arith.constant 0 : index
    %0 = vector.load %arg1[%c0, %c0_0] : memref<1x2048xf32, #tpu.memory_space<vmem>>, vector<1x2048xf32>
    %cst = arith.constant 5.000000e-01 : f32
    %1 = vector.broadcast %cst : f32 to vector<1x2048xf32>
    %2 = arith.mulf %1, %0 : vector<1x2048xf32>
    %3 = math.tanh %2 : vector<1x2048xf32>
    %cst_1 = arith.constant 1.000000e+00 : f32
    %4 = vector.broadcast %cst_1 : f32 to vector<1x2048xf32>
    %5 = arith.addf %4, %3 : vector<1x2048xf32>
    %cst_2 = arith.constant 5.000000e-01 : f32
    %6 = vector.broadcast %cst_2 : f32 to vector<1x2048xf32>
    %7 = arith.mulf %6, %5 : vector<1x2048xf32>
    %cst_3 = arith.constant 2.000000e+00 : f32
    %8 = vector.broadcast %cst_3 : f32 to vector<1x2048xf32>
    %9 = arith.mulf %8, %3 : vector<1x2048xf32>
    %10 = arith.mulf %3, %3 : vector<1x2048xf32>
    %cst_4 = arith.constant 1.000000e+00 : f32
    %11 = vector.broadcast %cst_4 : f32 to vector<1x2048xf32>
    %12 = arith.addf %11, %10 : vector<1x2048xf32>
    %13 = tpu.reciprocal %12 {approx = true} : vector<1x2048xf32> -> vector<1x2048xf32>
    %14 = arith.mulf %9, %13 : vector<1x2048xf32>
    %15 = arith.mulf %0, %7 : vector<1x2048xf32>
    %cst_5 = arith.constant 5.000000e-01 : f32
    %16 = vector.broadcast %cst_5 : f32 to vector<1x2048xf32>
    %17 = arith.mulf %16, %14 : vector<1x2048xf32>
    %18 = arith.addf %15, %17 : vector<1x2048xf32>
    %c0_6 = arith.constant 0 : index
    %c0_7 = arith.constant 0 : index
    %19 = vector.load %arg2[%c0_6, %c0_7] : memref<1x2048xf32, #tpu.memory_space<vmem>>, vector<1x2048xf32>
    tpu.vector_store %arg2[%c0_6, %c0_7], %18 {strides = array<i32>} : memref<1x2048xf32, #tpu.memory_space<vmem>>, vector<1x2048xf32>,
    return
  }
  func.func @transform_0(%arg0: i32) -> (i32, i32) {
    %c0_i32 = arith.constant 0 : i32
    %c0_i32_0 = arith.constant 0 : i32
    return %arg0, %c0_i32 : i32, i32
  }
  func.func @transform_1(%arg0: i32) -> (i32, i32) {
    %c0_i32 = arith.constant 0 : i32
    %c0_i32_0 = arith.constant 0 : i32
    return %arg0, %c0_i32 : i32, i32
  }
}

</mosaic_0001>

<bundles_post_ra>
// kernel: tpu_custom_call.1
= control target key start
LH: loop header
LB: loop body
LE: loop exit
PB: predicated region body
PF: predicated region fallthrough
CT: control target
= control target key end

     0   :  { %6 = vsyncpa [#allocation3], 0  ;;  %s136_s0 = inlined_call_operand.hbm [shape: f32[1,2048], index: 0, kind: input, shape index: {}]   ;;  %s137_s1 = inlined_call_operand.hbm [shape: f32[1,2048], index: 1, kind: output, shape index: {}]  }
   0x1   :  { %7 = vsyncpa [#allocation4], 0  ;;  %s118_s6 = smov [#allocation2]  }
   0x2   :  { %s14_s7 = sshll.u32 %s118_s6, 4  ;;  %s15_s7 = int_to_ptr.vmem [resolvable:$true] %s14_s7 }
   0x3   :  { %s82_s8 = scalar_lea.vmem %s15_s7, 256  ;;  %p87_p1 = scmp.lt.s32.totalorder %s15_s7, %s15_s7 }
   0x4   :  { %p83_p0 = scmp.ne.s32.totalorder %s15_s7, %s82_s8  ;;  %p88_p2 = scmp.lt.s32.totalorder %s82_s8, %s82_s8 }
   0x6   :  { %p89_p3 = por %p88_p2, %p87_p1 }
   0x8   :  { %p90_p4 = pnand %p89_p3, %p83_p0 }
   0xa   :  { %93 = shalt.err (!%p90_p4)
}
   0xb   :  { %17 = dma.hbm_to_vmem [thread:$0]  %s136_s0, 256, %s15_s7, [#allocation3]  }
   0xc   :  { %114 = dma.done.wait [#allocation3], 256  }
   0xd   :  { %115 = vsyncadd [#allocation3], 4294967040  ;;  %v21_v0 = vld [vmem:[#allocation2] sm:$0xff]  ;;  %v22_v1 = vld [vmem:[#allocation2 + $0x8] sm:$0xff]  ;;  %s119_s0 = smov [#allocation5]  }
   0xe   :  { %v23_v2 = vmul.f32 0.5, %v21_v0  ;;  %v24_v3 = vmul.f32 0.5, %v22_v1  ;;  %s55_s11 = sshll.u32 %s119_s0, 4  ;;  %s56_s11 = int_to_ptr.vmem [resolvable:$true] %s55_s11 }
   0xf   :  { %s94_s12 = scalar_lea.vmem %s56_s11, 256  ;;  %p99_p6 = scmp.lt.s32.totalorder %s56_s11, %s56_s11 }
  0x10   :  { %66 = vtanh.f32 %v23_v2  ;;  %p95_p5 = scmp.ne.s32.totalorder %s56_s11, %s94_s12  ;;  %p100_p7 = scmp.lt.s32.totalorder %s94_s12, %s94_s12 }
  0x11   :  { %68 = vtanh.f32 %v24_v3 }
  0x12   :  { %p101_p8 = por %p100_p7, %p99_p6 }
  0x14   :  { %p102_p9 = pnand %p101_p8, %p95_p5 }
  0x1d   :  { %v67_v4 = vpop.eup %66 }
  0x1e   :  { %v69_v5 = vpop.eup %68  ;;  %v33_v6 = vmul.f32 %v67_v4, %v67_v4  ;;  %v27_v10 = vadd.f32 1.0, %v67_v4  ;;  %v31_v13 = vmul.f32 2.0, %v67_v4 }
  0x1f   :  { %v34_v7 = vmul.f32 %v69_v5, %v69_v5  ;;  %v28_v11 = vadd.f32 1.0, %v69_v5  ;;  %v32_v15 = vmul.f32 2.0, %v69_v5 }
  0x20   :  { %v35_v8 = vadd.f32 1.0, %v33_v6  ;;  %v29_v12 = vmul.f32 0.5, %v27_v10 }
  0x21   :  { %v36_v9 = vadd.f32 1.0, %v34_v7  ;;  %v30_v14 = vmul.f32 0.5, %v28_v11 }
  0x22   :  { %70 = vrcp.f32 %v35_v8  ;;  %v41_v19 = vmul.f32 %v29_v12, %v21_v0 }
  0x23   :  { %72 = vrcp.f32 %v36_v9  ;;  %v42_v21 = vmul.f32 %v30_v14, %v22_v1 }
  0x2f   :  { %v71_v16 = vpop.eup %70 }
  0x30   :  { %v73_v17 = vpop.eup %72  ;;  %v39_v18 = vmul.f32 %v71_v16, %v31_v13 }
  0x31   :  { %v40_v20 = vmul.f32 %v73_v17, %v32_v15 }
  0x32   :  { %v43_v22 = vmul.f32 0.5, %v39_v18 }
  0x33   :  { %v44_v23 = vmul.f32 0.5, %v40_v20 }
  0x34   :  { %v45_v24 = vadd.f32 %v43_v22, %v41_v19 }
  0x35   :  { %v46_v25 = vadd.f32 %v44_v23, %v42_v21 }
  0x36   :  { %47 = vst [vmem:[#allocation5] sm:$0xff] %v45_v24 }
  0x37   :  { %48 = vst [vmem:[#allocation5 + $0x8] sm:$0xff] %v46_v25 }
  0x38   :  { %105 = shalt.err (!%p102_p9)
}
  0x39   :  { %58 = dma.vmem_to_hbm [thread:$0]  %s56_s11, 256, %s137_s1, [#allocation4]  }
  0x3a   :  { %116 = dma.done.wait [#allocation4], 256  }
  0x3b   :  { %117 = vsyncadd [#allocation4], 4294967040 }
  0x3c   :  { %62 = vsyncpa [#allocation3], 1 }
  0x3d   :  { %63 = vsyncpa [#allocation4], 1 }

</bundles_post_ra>
